<compile_context>
chip_gen: v6e
topology: v6e:2x2x1
jax: 0.10.0
libtpu: 0.0.40
codegen_flags: <defaults>
</compile_context>

<pallas_src>
import functools

import jax
import jax.numpy as jnp
import numpy as np
from jax import lax
from jax.experimental import pallas as pl
from jax.experimental.pallas import tpu as pltpu


def _round_up(v, m):
    return (v + m - 1) // m * m


def _dsconv_kernel(x_ref, cmask_ref, dw_ref, b1_ref, pw_ref, b2_ref,
                   o_ref, xp_ref, *, H, W, KH, KW, pad, PL):
    """Fused depthwise KxK conv + BN1 + ReLU + pointwise 1x1 + BN2 + ReLU.

    Layouts (spatial flattened onto the lane axis, P = H*W):
      x_ref    : (1, Cin, P)      VMEM  one image, NCHW order, flat spatial
      cmask_ref: (KW, 1, P)       VMEM  0/1 column-validity mask per horiz. tap
      dw_ref   : (KH*KW, Cin, 1)  VMEM  depthwise weights, BN1 scale folded in
      b1_ref   : (Cin, 1)         VMEM  BN1 shift
      pw_ref   : (Cout, Cin)      VMEM  pointwise weights, BN2 scale folded in
      b2_ref   : (Cout, 1)        VMEM  BN2 shift
      o_ref    : (1, Cout, P)     VMEM  output, flat spatial (lane-dense store)
      xp_ref   : (Cin, WTOT)      VMEM  scratch: zero halo + image, flat
    """
    cin = x_ref.shape[1]
    cout = o_ref.shape[1]
    P = H * W
    WTOT = xp_ref.shape[1]
    f32 = jnp.float32

    # ---- Stage the image into the zero-haloed flat scratch.  The interior
    # store starts at lane offset PL (multiple of 128 -> aligned).  Halos are
    # re-zeroed every step so the kernel stays correct under megacore grid
    # splitting (cheap: a few hundred lanes).
    right = WTOT - PL - P
    if PL > 0:
        xp_ref[:, 0:PL] = jnp.zeros((cin, PL), f32)
    if right > 0:
        xp_ref[:, PL + P:WTOT] = jnp.zeros((cin, right), f32)
    xp_ref[:, PL:PL + P] = x_ref[0].astype(f32)

    # ---- Depthwise KxK conv (+ folded BN1 scale) + BN1 shift + ReLU.
    # For each tap, ONE shifted (Cin, P) lane-slice of the haloed scratch,
    # FMA'd with a per-channel (Cin, 1) weight column.  Vertical out-of-image
    # taps land in the zero halo; horizontal row-wraparound terms of the flat
    # layout are killed by the column mask (applied once per kw, factored
    # over kh).  Pure VPU work, no MXU, no relayouts.
    base = PL - pad * W - pad
    acc = jnp.zeros((cin, P), f32)
    for kw in range(KW):
        acc_kw = jnp.zeros((cin, P), f32)
        for kh in range(KH):
            start = base + kh * W + kw
            tap = xp_ref[:, start:start + P]                 # (Cin, P)
            acc_kw = acc_kw + tap * dw_ref[kh * KW + kw]     # * (Cin, 1)
        acc = acc + acc_kw * cmask_ref[kw]                   # * (1, P)
    y = jnp.maximum(acc + b1_ref[...], 0.0)                  # (Cin, P)

    # ---- Pointwise 1x1 conv (+ folded BN2 scale) + BN2 shift + ReLU.
    # Cin is tiny, so this is Cin broadcasted VPU FMAs onto a lane-dense
    # (Cout, P) tile instead of a degenerate MXU matmul.
    z = jnp.zeros((cout, P), f32)
    for ci in range(cin):
        z = z + y[ci:ci + 1, :] * pw_ref[:, ci:ci + 1]       # (1,P) x (Cout,1)
    z = jnp.maximum(z + b2_ref[...], 0.0)

    # Lane-dense store (last dim = H*W) -> already in PyTorch NCHW order.
    o_ref[0] = z.astype(o_ref.dtype)


def depthwise_separable_conv(x_nchw, dw_w, pw_w,
                             bn1_gamma, bn1_beta, bn1_mean, bn1_var,
                             bn2_gamma, bn2_beta, bn2_mean, bn2_var,
                             *, padding, eps=1e-5):
    """x_nchw: (N, Cin, H, W) f32.  dw_w: (Cin,1,KH,KW).  pw_w: (Cout,Cin,1,1)."""
    N, Cin, H, W = x_nchw.shape
    KH, KW = int(dw_w.shape[2]), int(dw_w.shape[3])
    Cout = int(pw_w.shape[0])
    p = int(padding)
    P = H * W
    assert KH == 2 * p + 1 and KW == 2 * p + 1, (
        "kernel supports stride-1 'same'-size depthwise convs (k == 2*pad+1)")

    halo = p * W + p
    PL = _round_up(halo, 128)                       # lane-aligned left halo
    WTOT = PL + _round_up(P + halo, 128)            # scratch width (mult. of 128)

    # Free view: NCHW with spatial flattened onto the last (lane) axis.
    x_flat = x_nchw.reshape(N, Cin, P)

    # Fold eval-mode BatchNorms into conv weights (scale) and per-channel shifts.
    s1 = bn1_gamma / jnp.sqrt(bn1_var + eps)                          # (Cin,)
    b1 = bn1_beta - bn1_mean * s1                                     # (Cin,)
    s2 = bn2_gamma / jnp.sqrt(bn2_var + eps)                          # (Cout,)
    b2 = bn2_beta - bn2_mean * s2                                     # (Cout,)

    dw_scaled = dw_w[:, 0, :, :] * s1[:, None, None]                  # (Cin,KH,KW)
    dw_eff = jnp.transpose(dw_scaled, (1, 2, 0)).reshape(KH * KW, Cin, 1)
    b1_col = b1.reshape(Cin, 1)
    pw_eff = pw_w[:, :, 0, 0] * s2[:, None]                           # (Cout, Cin)
    b2_col = b2.reshape(Cout, 1)

    # Column-validity masks for each horizontal tap of the flat layout.
    cols = jnp.arange(P, dtype=jnp.int32) % W
    cmask = jnp.stack(
        [(cols + (kw - p) >= 0) & (cols + (kw - p) <= W - 1) for kw in range(KW)]
    ).astype(jnp.float32).reshape(KW, 1, P)

    kernel = functools.partial(_dsconv_kernel, H=H, W=W, KH=KH, KW=KW,
                               pad=p, PL=PL)

    out_flat = pl.pallas_call(
        kernel,
        out_shape=jax.ShapeDtypeStruct((N, Cout, P), jnp.float32),
        grid_spec=pltpu.PrefetchScalarGridSpec(
            num_scalar_prefetch=0,
            grid=(N,),
            in_specs=[
                pl.BlockSpec((1, Cin, P), lambda n: (n, 0, 0)),        # x (flat NCHW)
                pl.BlockSpec((KW, 1, P), lambda n: (0, 0, 0)),         # column masks
                pl.BlockSpec((KH * KW, Cin, 1), lambda n: (0, 0, 0)),  # depthwise w * s1
                pl.BlockSpec((Cin, 1), lambda n: (0, 0)),              # BN1 shift
                pl.BlockSpec((Cout, Cin), lambda n: (0, 0)),           # pointwise w * s2
                pl.BlockSpec((Cout, 1), lambda n: (0, 0)),             # BN2 shift
            ],
            out_specs=pl.BlockSpec((1, Cout, P), lambda n: (n, 0, 0)),
            scratch_shapes=[pltpu.VMEM((Cin, WTOT), jnp.float32)],
        ),
        compiler_params=pltpu.CompilerParams(
            dimension_semantics=("parallel",),
            vmem_limit_bytes=32 * 1024 * 1024),
    )(x_flat, cmask, dw_eff, b1_col, pw_eff, b2_col)

    # Free view back to PyTorch NCHW — no transpose anywhere.
    return out_flat.reshape(N, Cout, H, W)


def _reference(x_nchw, dw_w, pw_w, g1, be1, m1, v1, g2, be2, m2, v2,
               *, padding, eps=1e-5):
    Cin = x_nchw.shape[1]
    y = lax.conv_general_dilated(
        x_nchw, dw_w, window_strides=(1, 1),
        padding=[(padding, padding), (padding, padding)],
        dimension_numbers=("NCHW", "OIHW", "NCHW"),
        feature_group_count=Cin)
    y = (y - m1[None, :, None, None]) / jnp.sqrt(v1[None, :, None, None] + eps)
    y = y * g1[None, :, None, None] + be1[None, :, None, None]
    y = jnp.maximum(y, 0.0)
    z = lax.conv_general_dilated(
        y, pw_w, window_strides=(1, 1), padding=[(0, 0), (0, 0)],
        dimension_numbers=("NCHW", "OIHW", "NCHW"))
    z = (z - m2[None, :, None, None]) / jnp.sqrt(v2[None, :, None, None] + eps)
    z = z * g2[None, :, None, None] + be2[None, :, None, None]
    return jnp.maximum(z, 0.0)


if __name__ == "__main__":
    # Small shapes consistent with the module: N=2, Cin=4, H=W=16, k=3, pad=1, Cout=8.
    N, Cin, H, W = 2, 4, 16, 16
    Cout, K, PAD = 8, 3, 1

    key = jax.random.PRNGKey(0)
    kx, kdw, kpw, kg1, kb1, kg2, kb2 = jax.random.split(key, 7)

    x = jax.random.normal(kx, (N, Cin, H, W), jnp.float32)
    # PyTorch weight shapes: depthwise (Cin, 1, K, K), pointwise (Cout, Cin, 1, 1)
    dw_w = jax.random.normal(kdw, (Cin, 1, K, K), jnp.float32) * 0.2
    pw_w = jax.random.normal(kpw, (Cout, Cin, 1, 1), jnp.float32) * 0.2
    # BatchNorm in eval mode (running stats mean=0, var=1), nontrivial affine.
    bn1_gamma = 1.0 + 0.1 * jax.random.normal(kg1, (Cin,), jnp.float32)
    bn1_beta = 0.1 * jax.random.normal(kb1, (Cin,), jnp.float32)
    bn1_mean = jnp.zeros((Cin,), jnp.float32)
    bn1_var = jnp.ones((Cin,), jnp.float32)
    bn2_gamma = 1.0 + 0.1 * jax.random.normal(kg2, (Cout,), jnp.float32)
    bn2_beta = 0.1 * jax.random.normal(kb2, (Cout,), jnp.float32)
    bn2_mean = jnp.zeros((Cout,), jnp.float32)
    bn2_var = jnp.ones((Cout,), jnp.float32)

    out = depthwise_separable_conv(
        x, dw_w, pw_w,
        bn1_gamma, bn1_beta, bn1_mean, bn1_var,
        bn2_gamma, bn2_beta, bn2_mean, bn2_var,
        padding=PAD)
    out = jax.block_until_ready(out)

    ref = _reference(
        x, dw_w, pw_w,
        bn1_gamma, bn1_beta, bn1_mean, bn1_var,
        bn2_gamma, bn2_beta, bn2_mean, bn2_var,
        padding=PAD)
    np.testing.assert_allclose(np.asarray(out), np.asarray(ref),
                               rtol=1e-4, atol=1e-4)

    print("KERNEL_OK")
</pallas_src>

<mosaic_0001>
module attributes {stable_mosaic.version = 11 : i64} {
  func.func @_dsconv_kernel(%arg0: i32, %arg1: memref<1x4x256xf32, #tpu.memory_space<vmem>>, %arg2: memref<3x1x256xf32, #tpu.memory_space<vmem>>, %arg3: memref<9x4x1xf32, #tpu.memory_space<vmem>>, %arg4: memref<4x1xf32, #tpu.memory_space<vmem>>, %arg5: memref<8x4xf32, #tpu.memory_space<vmem>>, %arg6: memref<8x1xf32, #tpu.memory_space<vmem>>, %arg7: memref<1x8x256xf32, #tpu.memory_space<vmem>>, %arg8: memref<4x512xf32, #tpu.memory_space<vmem>>) attributes {dimension_semantics = [#tpu.dimension_semantics<parallel>], iteration_bounds = array<i64: 2>, scalar_prefetch = 0 : i64, scratch_operands = 1 : i64, tpu.core_type = #tpu.core_type<tc>, window_params = [{transform_indices = @transform_0, window_bounds = array<i64: 1, 4, 256>}, {pipeline_mode = #tpu.pipeline_mode<synchronous>, transform_indices = @transform_1, window_bounds = array<i64: 3, 1, 256>}, {pipeline_mode = #tpu.pipeline_mode<synchronous>, transform_indices = @transform_2, window_bounds = array<i64: 9, 4, 1>}, {pipeline_mode = #tpu.pipeline_mode<synchronous>, transform_indices = @transform_3, window_bounds = array<i64: 4, 1>}, {pipeline_mode = #tpu.pipeline_mode<synchronous>, transform_indices = @transform_4, window_bounds = array<i64: 8, 4>}, {pipeline_mode = #tpu.pipeline_mode<synchronous>, transform_indices = @transform_5, window_bounds = array<i64: 8, 1>}, {transform_indices = @transform_6, window_bounds = array<i64: 1, 8, 256>}]} {
    %cst = arith.constant 0.000000e+00 : f32
    %0 = vector.broadcast %cst : f32 to vector<4x128xf32>
    %c0 = arith.constant 0 : index
    %c0_0 = arith.constant 0 : index
    %1 = vector.load %arg8[%c0, %c0_0] : memref<4x512xf32, #tpu.memory_space<vmem>>, vector<4x128xf32>
    tpu.vector_store %arg8[%c0, %c0_0], %0 {strides = array<i32>} : memref<4x512xf32, #tpu.memory_space<vmem>>, vector<4x128xf32>,
    %cst_1 = arith.constant 0.000000e+00 : f32
    %2 = vector.broadcast %cst_1 : f32 to vector<4x128xf32>
    %c0_2 = arith.constant 0 : index
    %c384 = arith.constant 384 : index
    %3 = vector.load %arg8[%c0_2, %c384] : memref<4x512xf32, #tpu.memory_space<vmem>>, vector<4x128xf32>
    tpu.vector_store %arg8[%c0_2, %c384], %2 {strides = array<i32>} : memref<4x512xf32, #tpu.memory_space<vmem>>, vector<4x128xf32>,
    %c0_3 = arith.constant 0 : index
    %c0_4 = arith.constant 0 : index
    %c0_5 = arith.constant 0 : index
    %4 = vector.load %arg1[%c0_3, %c0_4, %c0_5] : memref<1x4x256xf32, #tpu.memory_space<vmem>>, vector<1x4x256xf32>
    %5 = vector.shape_cast %4 : vector<1x4x256xf32> to vector<4x256xf32>
    %c0_6 = arith.constant 0 : index
    %c128 = arith.constant 128 : index
    %6 = vector.load %arg8[%c0_6, %c128] : memref<4x512xf32, #tpu.memory_space<vmem>>, vector<4x256xf32>
    tpu.vector_store %arg8[%c0_6, %c128], %5 {strides = array<i32>} : memref<4x512xf32, #tpu.memory_space<vmem>>, vector<4x256xf32>,
    %cst_7 = arith.constant 0.000000e+00 : f32
    %7 = vector.broadcast %cst_7 : f32 to vector<4x256xf32>
    %cst_8 = arith.constant 0.000000e+00 : f32
    %8 = vector.broadcast %cst_8 : f32 to vector<4x256xf32>
    %c0_9 = arith.constant 0 : index
    %c111 = arith.constant 111 : index
    %9 = vector.load %arg8[%c0_9, %c111] : memref<4x512xf32, #tpu.memory_space<vmem>>, vector<4x256xf32>
    %c0_10 = arith.constant 0 : index
    %c0_11 = arith.constant 0 : index
    %c0_12 = arith.constant 0 : index
    %10 = vector.load %arg3[%c0_10, %c0_11, %c0_12] : memref<9x4x1xf32, #tpu.memory_space<vmem>>, vector<1x4x1xf32>
    %11 = vector.shape_cast %10 : vector<1x4x1xf32> to vector<4x1xf32>
    %12 = vector.broadcast %11 : vector<4x1xf32> to vector<4x256xf32>
    %13 = arith.mulf %9, %12 : vector<4x256xf32>
    %14 = arith.addf %8, %13 : vector<4x256xf32>
    %c0_13 = arith.constant 0 : index
    %c127 = arith.constant 127 : index
    %15 = vector.load %arg8[%c0_13, %c127] : memref<4x512xf32, #tpu.memory_space<vmem>>, vector<4x256xf32>
    %c3 = arith.constant 3 : index
    %c0_14 = arith.constant 0 : index
    %c0_15 = arith.constant 0 : index
    %16 = vector.load %arg3[%c3, %c0_14, %c0_15] : memref<9x4x1xf32, #tpu.memory_space<vmem>>, vector<1x4x1xf32>
    %17 = vector.shape_cast %16 : vector<1x4x1xf32> to vector<4x1xf32>
    %18 = vector.broadcast %17 : vector<4x1xf32> to vector<4x256xf32>
    %19 = arith.mulf %15, %18 : vector<4x256xf32>
    %20 = arith.addf %14, %19 : vector<4x256xf32>
    %c0_16 = arith.constant 0 : index
    %c143 = arith.constant 143 : index
    %21 = vector.load %arg8[%c0_16, %c143] : memref<4x512xf32, #tpu.memory_space<vmem>>, vector<4x256xf32>
    %c6 = arith.constant 6 : index
    %c0_17 = arith.constant 0 : index
    %c0_18 = arith.constant 0 : index
    %22 = vector.load %arg3[%c6, %c0_17, %c0_18] : memref<9x4x1xf32, #tpu.memory_space<vmem>>, vector<1x4x1xf32>
    %23 = vector.shape_cast %22 : vector<1x4x1xf32> to vector<4x1xf32>
    %24 = vector.broadcast %23 : vector<4x1xf32> to vector<4x256xf32>
    %25 = arith.mulf %21, %24 : vector<4x256xf32>
    %26 = arith.addf %20, %25 : vector<4x256xf32>
    %c0_19 = arith.constant 0 : index
    %c0_20 = arith.constant 0 : index
    %c0_21 = arith.constant 0 : index
    %27 = vector.load %arg2[%c0_19, %c0_20, %c0_21] : memref<3x1x256xf32, #tpu.memory_space<vmem>>, vector<1x1x256xf32>
    %28 = vector.shape_cast %27 : vector<1x1x256xf32> to vector<1x256xf32>
    %29 = vector.broadcast %28 : vector<1x256xf32> to vector<4x256xf32>
    %30 = arith.mulf %26, %29 : vector<4x256xf32>
    %31 = arith.addf %7, %30 : vector<4x256xf32>
    %cst_22 = arith.constant 0.000000e+00 : f32
    %32 = vector.broadcast %cst_22 : f32 to vector<4x256xf32>
    %c0_23 = arith.constant 0 : index
    %c112 = arith.constant 112 : index
    %33 = vector.load %arg8[%c0_23, %c112] : memref<4x512xf32, #tpu.memory_space<vmem>>, vector<4x256xf32>
    %c1 = arith.constant 1 : index
    %c0_24 = arith.constant 0 : index
    %c0_25 = arith.constant 0 : index
    %34 = vector.load %arg3[%c1, %c0_24, %c0_25] : memref<9x4x1xf32, #tpu.memory_space<vmem>>, vector<1x4x1xf32>
    %35 = vector.shape_cast %34 : vector<1x4x1xf32> to vector<4x1xf32>
    %36 = vector.broadcast %35 : vector<4x1xf32> to vector<4x256xf32>
    %37 = arith.mulf %33, %36 : vector<4x256xf32>
    %38 = arith.addf %32, %37 : vector<4x256xf32>
    %c0_26 = arith.constant 0 : index
    %c128_27 = arith.constant 128 : index
    %39 = vector.load %arg8[%c0_26, %c128_27] : memref<4x512xf32, #tpu.memory_space<vmem>>, vector<4x256xf32>
    %c4 = arith.constant 4 : index
    %c0_28 = arith.constant 0 : index
    %c0_29 = arith.constant 0 : index
    %40 = vector.load %arg3[%c4, %c0_28, %c0_29] : memref<9x4x1xf32, #tpu.memory_space<vmem>>, vector<1x4x1xf32>
    %41 = vector.shape_cast %40 : vector<1x4x1xf32> to vector<4x1xf32>
    %42 = vector.broadcast %41 : vector<4x1xf32> to vector<4x256xf32>
    %43 = arith.mulf %39, %42 : vector<4x256xf32>
    %44 = arith.addf %38, %43 : vector<4x256xf32>
    %c0_30 = arith.constant 0 : index
    %c144 = arith.constant 144 : index
    %45 = vector.load %arg8[%c0_30, %c144] : memref<4x512xf32, #tpu.memory_space<vmem>>, vector<4x256xf32>
    %c7 = arith.constant 7 : index
    %c0_31 = arith.constant 0 : index
    %c0_32 = arith.constant 0 : index
    %46 = vector.load %arg3[%c7, %c0_31, %c0_32] : memref<9x4x1xf32, #tpu.memory_space<vmem>>, vector<1x4x1xf32>
    %47 = vector.shape_cast %46 : vector<1x4x1xf32> to vector<4x1xf32>
    %48 = vector.broadcast %47 : vector<4x1xf32> to vector<4x256xf32>
    %49 = arith.mulf %45, %48 : vector<4x256xf32>
    %50 = arith.addf %44, %49 : vector<4x256xf32>
    %c1_33 = arith.constant 1 : index
    %c0_34 = arith.constant 0 : index
    %c0_35 = arith.constant 0 : index
    %51 = vector.load %arg2[%c1_33, %c0_34, %c0_35] : memref<3x1x256xf32, #tpu.memory_space<vmem>>, vector<1x1x256xf32>
    %52 = vector.shape_cast %51 : vector<1x1x256xf32> to vector<1x256xf32>
    %53 = vector.broadcast %52 : vector<1x256xf32> to vector<4x256xf32>
    %54 = arith.mulf %50, %53 : vector<4x256xf32>
    %55 = arith.addf %31, %54 : vector<4x256xf32>
    %cst_36 = arith.constant 0.000000e+00 : f32
    %56 = vector.broadcast %cst_36 : f32 to vector<4x256xf32>
    %c0_37 = arith.constant 0 : index
    %c113 = arith.constant 113 : index
    %57 = vector.load %arg8[%c0_37, %c113] : memref<4x512xf32, #tpu.memory_space<vmem>>, vector<4x256xf32>
    %c2 = arith.constant 2 : index
    %c0_38 = arith.constant 0 : index
    %c0_39 = arith.constant 0 : index
    %58 = vector.load %arg3[%c2, %c0_38, %c0_39] : memref<9x4x1xf32, #tpu.memory_space<vmem>>, vector<1x4x1xf32>
    %59 = vector.shape_cast %58 : vector<1x4x1xf32> to vector<4x1xf32>
    %60 = vector.broadcast %59 : vector<4x1xf32> to vector<4x256xf32>
    %61 = arith.mulf %57, %60 : vector<4x256xf32>
    %62 = arith.addf %56, %61 : vector<4x256xf32>
    %c0_40 = arith.constant 0 : index
    %c129 = arith.constant 129 : index
    %63 = vector.load %arg8[%c0_40, %c129] : memref<4x512xf32, #tpu.memory_space<vmem>>, vector<4x256xf32>
    %c5 = arith.constant 5 : index
    %c0_41 = arith.constant 0 : index
    %c0_42 = arith.constant 0 : index
    %64 = vector.load %arg3[%c5, %c0_41, %c0_42] : memref<9x4x1xf32, #tpu.memory_space<vmem>>, vector<1x4x1xf32>
    %65 = vector.shape_cast %64 : vector<1x4x1xf32> to vector<4x1xf32>
    %66 = vector.broadcast %65 : vector<4x1xf32> to vector<4x256xf32>
    %67 = arith.mulf %63, %66 : vector<4x256xf32>
    %68 = arith.addf %62, %67 : vector<4x256xf32>
    %c0_43 = arith.constant 0 : index
    %c145 = arith.constant 145 : index
    %69 = vector.load %arg8[%c0_43, %c145] : memref<4x512xf32, #tpu.memory_space<vmem>>, vector<4x256xf32>
    %c8 = arith.constant 8 : index
    %c0_44 = arith.constant 0 : index
    %c0_45 = arith.constant 0 : index
    %70 = vector.load %arg3[%c8, %c0_44, %c0_45] : memref<9x4x1xf32, #tpu.memory_space<vmem>>, vector<1x4x1xf32>
    %71 = vector.shape_cast %70 : vector<1x4x1xf32> to vector<4x1xf32>
    %72 = vector.broadcast %71 : vector<4x1xf32> to vector<4x256xf32>
    %73 = arith.mulf %69, %72 : vector<4x256xf32>
    %74 = arith.addf %68, %73 : vector<4x256xf32>
    %c2_46 = arith.constant 2 : index
    %c0_47 = arith.constant 0 : index
    %c0_48 = arith.constant 0 : index
    %75 = vector.load %arg2[%c2_46, %c0_47, %c0_48] : memref<3x1x256xf32, #tpu.memory_space<vmem>>, vector<1x1x256xf32>
    %76 = vector.shape_cast %75 : vector<1x1x256xf32> to vector<1x256xf32>
    %77 = vector.broadcast %76 : vector<1x256xf32> to vector<4x256xf32>
    %78 = arith.mulf %74, %77 : vector<4x256xf32>
    %79 = arith.addf %55, %78 : vector<4x256xf32>
    %c0_49 = arith.constant 0 : index
    %c0_50 = arith.constant 0 : index
    %80 = vector.load %arg4[%c0_49, %c0_50] : memref<4x1xf32, #tpu.memory_space<vmem>>, vector<4x1xf32>
    %81 = vector.broadcast %80 : vector<4x1xf32> to vector<4x256xf32>
    %82 = arith.addf %79, %81 : vector<4x256xf32>
    %cst_51 = arith.constant 0.000000e+00 : f32
    %83 = vector.broadcast %cst_51 : f32 to vector<4x256xf32>
    %84 = arith.maximumf %82, %83 : vector<4x256xf32>
    %cst_52 = arith.constant 0.000000e+00 : f32
    %85 = vector.broadcast %cst_52 : f32 to vector<8x256xf32>
    %86 = vector.extract_strided_slice %84 {offsets = [0, 0], sizes = [1, 256], strides = [1, 1]} : vector<4x256xf32> to vector<1x256xf32>
    %c0_53 = arith.constant 0 : index
    %c0_54 = arith.constant 0 : index
    %87 = vector.load %arg5[%c0_53, %c0_54] : memref<8x4xf32, #tpu.memory_space<vmem>>, vector<8x1xf32>
    %88 = vector.broadcast %86 : vector<1x256xf32> to vector<8x256xf32>
    %89 = vector.broadcast %87 : vector<8x1xf32> to vector<8x256xf32>
    %90 = arith.mulf %88, %89 : vector<8x256xf32>
    %91 = arith.addf %85, %90 : vector<8x256xf32>
    %92 = vector.extract_strided_slice %84 {offsets = [1, 0], sizes = [1, 256], strides = [1, 1]} : vector<4x256xf32> to vector<1x256xf32>
    %c0_55 = arith.constant 0 : index
    %c1_56 = arith.constant 1 : index
    %93 = vector.load %arg5[%c0_55, %c1_56] : memref<8x4xf32, #tpu.memory_space<vmem>>, vector<8x1xf32>
    %94 = vector.broadcast %92 : vector<1x256xf32> to vector<8x256xf32>
    %95 = vector.broadcast %93 : vector<8x1xf32> to vector<8x256xf32>
    %96 = arith.mulf %94, %95 : vector<8x256xf32>
    %97 = arith.addf %91, %96 : vector<8x256xf32>
    %98 = vector.extract_strided_slice %84 {offsets = [2, 0], sizes = [1, 256], strides = [1, 1]} : vector<4x256xf32> to vector<1x256xf32>
    %c0_57 = arith.constant 0 : index
    %c2_58 = arith.constant 2 : index
    %99 = vector.load %arg5[%c0_57, %c2_58] : memref<8x4xf32, #tpu.memory_space<vmem>>, vector<8x1xf32>
    %100 = vector.broadcast %98 : vector<1x256xf32> to vector<8x256xf32>
    %101 = vector.broadcast %99 : vector<8x1xf32> to vector<8x256xf32>
    %102 = arith.mulf %100, %101 : vector<8x256xf32>
    %103 = arith.addf %97, %102 : vector<8x256xf32>
    %104 = vector.extract_strided_slice %84 {offsets = [3, 0], sizes = [1, 256], strides = [1, 1]} : vector<4x256xf32> to vector<1x256xf32>
    %c0_59 = arith.constant 0 : index
    %c3_60 = arith.constant 3 : index
    %105 = vector.load %arg5[%c0_59, %c3_60] : memref<8x4xf32, #tpu.memory_space<vmem>>, vector<8x1xf32>
    %106 = vector.broadcast %104 : vector<1x256xf32> to vector<8x256xf32>
    %107 = vector.broadcast %105 : vector<8x1xf32> to vector<8x256xf32>
    %108 = arith.mulf %106, %107 : vector<8x256xf32>
    %109 = arith.addf %103, %108 : vector<8x256xf32>
    %c0_61 = arith.constant 0 : index
    %c0_62 = arith.constant 0 : index
    %110 = vector.load %arg6[%c0_61, %c0_62] : memref<8x1xf32, #tpu.memory_space<vmem>>, vector<8x1xf32>
    %111 = vector.broadcast %110 : vector<8x1xf32> to vector<8x256xf32>
    %112 = arith.addf %109, %111 : vector<8x256xf32>
    %cst_63 = arith.constant 0.000000e+00 : f32
    %113 = vector.broadcast %cst_63 : f32 to vector<8x256xf32>
    %114 = arith.maximumf %112, %113 : vector<8x256xf32>
    %c0_64 = arith.constant 0 : index
    %c0_65 = arith.constant 0 : index
    %c0_66 = arith.constant 0 : index
    %115 = vector.load %arg7[%c0_64, %c0_65, %c0_66] : memref<1x8x256xf32, #tpu.memory_space<vmem>>, vector<1x8x256xf32>
    %116 = vector.shape_cast %115 : vector<1x8x256xf32> to vector<8x256xf32>
    %117 = vector.shape_cast %114 : vector<8x256xf32> to vector<1x8x256xf32>
    tpu.vector_store %arg7[%c0_64, %c0_65, %c0_66], %117 {strides = array<i32>} : memref<1x8x256xf32, #tpu.memory_space<vmem>>, vector<1x8x256xf32>,
    return
  }
  func.func @transform_0(%arg0: i32) -> (i32, i32, i32) {
    %c0_i32 = arith.constant 0 : i32
    %c0_i32_0 = arith.constant 0 : i32
    %c0_i32_1 = arith.constant 0 : i32
    return %arg0, %c0_i32, %c0_i32_0 : i32, i32, i32
  }
  func.func @transform_1(%arg0: i32) -> (i32, i32, i32) {
    %c0_i32 = arith.constant 0 : i32
    %c0_i32_0 = arith.constant 0 : i32
    %c0_i32_1 = arith.constant 0 : i32
    %c0_i32_2 = arith.constant 0 : i32
    return %c0_i32, %c0_i32_0, %c0_i32_1 : i32, i32, i32
  }
  func.func @transform_2(%arg0: i32) -> (i32, i32, i32) {
    %c0_i32 = arith.constant 0 : i32
    %c0_i32_0 = arith.constant 0 : i32
    %c0_i32_1 = arith.constant 0 : i32
    %c0_i32_2 = arith.constant 0 : i32
    return %c0_i32, %c0_i32_0, %c0_i32_1 : i32, i32, i32
  }
  func.func @transform_3(%arg0: i32) -> (i32, i32) {
    %c0_i32 = arith.constant 0 : i32
    %c0_i32_0 = arith.constant 0 : i32
    %c0_i32_1 = arith.constant 0 : i32
    return %c0_i32, %c0_i32_0 : i32, i32
  }
  func.func @transform_4(%arg0: i32) -> (i32, i32) {
    %c0_i32 = arith.constant 0 : i32
    %c0_i32_0 = arith.constant 0 : i32
    %c0_i32_1 = arith.constant 0 : i32
    return %c0_i32, %c0_i32_0 : i32, i32
  }
  func.func @transform_5(%arg0: i32) -> (i32, i32) {
    %c0_i32 = arith.constant 0 : i32
    %c0_i32_0 = arith.constant 0 : i32
    %c0_i32_1 = arith.constant 0 : i32
    return %c0_i32, %c0_i32_0 : i32, i32
  }
  func.func @transform_6(%arg0: i32) -> (i32, i32, i32) {
    %c0_i32 = arith.constant 0 : i32
    %c0_i32_0 = arith.constant 0 : i32
    %c0_i32_1 = arith.constant 0 : i32
    return %arg0, %c0_i32, %c0_i32_0 : i32, i32, i32
  }
}

</mosaic_0001>

<bundles_post_ra>
// kernel: tpu_custom_call.1
= control target key start
LH: loop header
LB: loop body
LE: loop exit
PB: predicated region body
PF: predicated region fallthrough
CT: control target
= control target key end

     0   :  { %11 = vsyncpa [#allocation4], 0  ;;  %s1280_s0 = inlined_call_operand.vmem [shape: f32[2,4,256], index: 0, kind: input, shape index: {}]   ;;  %s1281_s1 = inlined_call_operand.vmem [shape: f32[3,1,256], index: 1, kind: input, shape index: {}]   ;;  %s1282_s2 = inlined_call_operand.vmem [shape: f32[9,4,1], index: 2, kind: input, shape index: {}]   ;;  %s1283_s3 = inlined_call_operand.vmem [shape: f32[4,1], index: 3, kind: input, shape index: {}]   ;;  %s1284_s4 = inlined_call_operand.vmem [shape: f32[8,4], index: 4, kind: input, shape index: {}]   ;;  %s1285_s5 = inlined_call_operand.vmem [shape: f32[8,1], index: 5, kind: input, shape index: {}]   ;;  %s1286_s6 = inlined_call_operand.hbm [shape: f32[2,8,256], index: 6, kind: output, shape index: {}]  }
   0x1   :  { %13 = vsyncpa [#allocation4 + $0x1], 0  ;;  %s1051_s21 = smov 0   ;;  %s1053_s22 = smov 0  }
   0x2   :  { %s1055_s23 = smov 0   ;;  %s1057_s24 = smov 0  }
   0x3 LB: > { %s1072_s25 = sadd.s32 4294967295, %s1000_s24   ;;  %s857_s26 = sadd.s32 4294967294, %s1000_s24   ;;  %s1000_s24 = sphi %s1057_s24, %s1292_s24   ;;  %s996_s23 = sphi %s1055_s23, %s1291_s23   ;;  %s992_s22 = sphi %s1053_s22, %s1290_s22   ;;  %s988_s21 = sphi %s1051_s21, %s1289_s21  }
   0x4   : > { %s1076_s27 = sadd.s32 1, %s1000_s24   ;;  %s157_s28 = sadd.s32 1, %s996_s23 }
   0x5   : > { %s154_s29 = ssub.s32 %s1000_s24, %s1076_s27  ;;  %p167_p0 = scmp.ne.s32.totalorder %s996_s23, %s992_s22 }
   0x6   : > { %p155_p1 = scmp.eq.s32.totalorder %s154_s29, 0  ;;  %p168_p2 = scmp.eq.s32.totalorder %s1072_s25, 1 }
   0x7   : > { %p173_p3 = scmp.ne.s32.totalorder %s992_s22, %s988_s21  ;;  %p174_p4 = scmp.eq.s32.totalorder %s857_s26, 1 }
   0x8   : > { %s1087_s30 = scalar_select %p155_p1, %s996_s23, %s157_s28  }
   0x9   : > { %p1089_p5 = por %p168_p2, %p167_p0  ;;  %p1093_p6 = por %p174_p4, %p173_p3 }
   0xa   : > { %p860_p7 = scmp.ge.s32.totalorder %s1000_s24, 1  ;;  %p215_p8 = scmp.lt.s32.totalorder %s1000_s24, 3 }
   0xc   : > { %p216_p9 = pnand %p860_p7, %p215_p8 }
   0xd   : > { %p245_p10 = scmp.lt.s32.totalorder (!%p216_p9), %s1072_s25, 1  ;;  %s1006_s20 = smov (!%p216_p9), 96  }
   0xe   : > { %219 = sbr.rel (%p216_p9) target bundleno = 560 (0x230), region = 44  ;;  %s1008_s9 = smov (!%p216_p9), 111  }
   0xf   : > { %s1010_s14 = smov (!%p216_p9), 127   ;;  %s1011_s15 = smov (!%p216_p9), 126  }
  0x10   : > { %s242_s26 = sand.u32 (!%p216_p9), 1, %s992_s22   ;;  %s1015_s16 = smov (!%p216_p9), [#allocation3]  }
  0x11   : > { %s861_s28 = sshll.u32 (!%p216_p9), %s242_s26, 4 }
  0x13   : > { %v871_v0 = vld [vmem:[%s1282_s2 + $0x14] sm:$0xf]  ;;  %v867_v1 = vld [vmem:[%s1282_s2 + $0x10] sm:$0xf]  ;;  %v264_v2 = vlaneseq  ;;  %v1002_v3 = vmov 0   ;;  %s246_s17 = scalar_select %p245_p10, %s1072_s25, 1 }
  0x14   : > { %934 = vset.pattern.permute.xlu1 %v1002_v3  ;;  %933 = vset.pattern.permute.xlu0 %v1002_v3  ;;  %v872_v4 = vld [vmem:[%s1282_s2 + $0x20] sm:$0xf]  ;;  %v868_v5 = vld [vmem:[%s1282_s2 + $0x1c] sm:$0xf]  ;;  %v1003_v7 = vmov 0.0   ;;  %v1009_v61 = vmov 1  }
  0x15   : > { %496 = vperm.xlu1 %934, %v871_v0   ;;  %384 = vperm.xlu0 %933, %v867_v1   ;;  %v1114_v6 = vshrl.u32 %v264_v2, 7  ;;  %251 = vst [vmem:[#allocation2 + $0xc] sm:$0xf] %v1003_v7  ;;  %250 = vst [vmem:[#allocation2] sm:$0xf] %v1003_v7  ;;  %s879_s18 = sshll.u32 %s246_s17, 3 }
  0x16   : > { %v866_v8 = vld [vmem:[%s1282_s2 + $0x4] sm:$0xf]  ;;  %s249_s29 = scalar_lea.vmem %s1280_s0, %s879_s18  ;;  %v864_v11 = vld [vmem:[%s1282_s2 + $0xc] sm:$0xf]  ;;  %v869_v13 = vld [vmem:[%s1281_s1 + $0x2] sm:$0x3] }
  0x17   : > { %v1124_v9 = vsub.s32 0, %v1114_v6  ;;  %v1127_v10 = vsub.s32 1, %v1114_v6  ;;  %v1132_v12 = vld [vmem:[%s249_s29] sm:$0xff]  ;;  %v865_v16 = vld [vmem:[%s1282_s2 + $0x18] sm:$0xf]  ;;  %s1004_s17 = smov 112  }
  0x18   : > { %253 = vst [vmem:[#allocation2 + $0x4] sm:$0xff] %v1132_v12  ;;  %v870_v17 = vld [vmem:[%s1282_s2 + $0x8] sm:$0xf]  ;;  %v1005_v19 = vmov 839922192   ;;  %s1007_s29 = smov 113  }
  0x19   : > { %525 = vperm.xlu1 %934, %v872_v4   ;;  %410 = vperm.xlu0 %933, %v868_v5   ;;  %v441_v14 = vrot.slane %v869_v13, %v1124_v9  ;;  %v445_v15 = vrot.slane %v869_v13, %v1127_v10  ;;  %v262_v20 = vunpack.c.l.s4 %v1005_v19  ;;  %v873_v33 = vld [vmem:[%s1281_s1 + $0x4] sm:$0x3]  ;;  %v337_v39 = vld [vmem:[%s1281_s1] sm:$0x3]  ;;  %vm299_vm0 = vcmask 916480  }
  0x1a   : > { %v556_v37 = vrot.slane %v873_v33, %v1124_v9  ;;  %v560_v38 = vrot.slane %v873_v33, %v1127_v10  ;;  %v342_v43 = vrot.slane %v337_v39, %v1124_v9  ;;  %v346_v44 = vrot.slane %v337_v39, %v1127_v10  ;;  %v256_v53 = vld [vmem:[%s1282_s2] sm:$0xf] }
  0x1b   : > { %v446_v18 = vcombine.low %v441_v14, %v445_v15  ;;  %v263_v21 = vunpack.c.0.s8 %v262_v20  ;;  %v586_v56 = vld [vmem:[%s1283_s3] sm:$0xf]  ;;  %vm330_vm1 = vcmask 785408   ;;  %vm565_vm2 = vcmask 924672  }
  0x1c   : > { %v405_v35 = vld [vmem:[#allocation2 + $0xc] sm:$0xf]  ;;  %v561_v42 = vcombine.low %v556_v37, %v560_v38  ;;  %v347_v48 = vcombine.low %v342_v43, %v346_v44  ;;  %vm297_vm3 = vcmask 1043456   ;;  %vm351_vm4 = vcmask 908288  }
  0x1d   : > { %365 = vperm.xlu1 %934, %v866_v8   ;;  %277 = vperm.xlu0 %933, %v864_v11   ;;  %v1148_v22 = vsub.s32 %v263_v21, %v1114_v6  ;;  %v491_v41 = vld [vmem:[#allocation2 + $0xc] sm:$0xf]  ;;  %vm464_vm5 = vcmask 1039360   ;;  %vm580_vm6 = vcmask 1031168   ;;  %vm776_vm7 = vcmask 138240  }
  0x1e   : > { %v306_v60 = vld [vmem:[#allocation2 + $0xc] sm:$0xf] }
  0x1f   : > { %v1175_v51 = vld [vmem:[#allocation2] sm:$0xff]  ;;  %v1188_v58 = vld [vmem:[#allocation2 + $0x8] sm:$0xf] }
  0x20   : > { %v360_v5 = vld [vmem:[#allocation2 + $0x8] sm:$0xf] }
  0x21   : > { %311 = vperm.xlu1 %934, %v865_v16   ;;  %476 = vperm.xlu0 %933, %v870_v17  }
  0x25   : > { %447 = vrot.lane.b32.xlu0 %v446_v18, %s1004_s17 }
  0x90   : > { %v497_v23 = vpop.permute.xlu1 %496  ;;  %v385_v24 = vpop.permute.xlu0 %384 }
  0x91   : > { %v504_v25 = vrot.slane %v497_v23, %v1148_v22  ;;  %v392_v26 = vrot.slane %v385_v24, %v1148_v22 }
  0x93   : > { %v394_v27 = vmul.f32 %v392_v26, %v1132_v12  ;;  %v506_v30 = vmul.f32 %v504_v25, %v1132_v12  ;;  %v507_v46 = vmul.f32 %v504_v25, %v491_v41 }
  0x94   : > { %v526_v28 = vpop.permute.xlu1 %525  ;;  %v411_v29 = vpop.permute.xlu0 %410 }
  0x95   : > { %v533_v31 = vrot.slane %v526_v28, %v1148_v22  ;;  %v418_v32 = vrot.slane %v411_v29, %v1148_v22  ;;  %396 = vrot.lane.b32.xlu0 %v394_v27, %s1004_s17 }
  0x97   : > { %v420_v34 = vmul.f32 %v418_v32, %v1132_v12  ;;  %v535_v36 = vmul.f32 %v533_v31, %v1132_v12  ;;  %v421_v40 = vmul.f32 %v418_v32, %v405_v35  ;;  %v536_v49 = vmul.f32 %v533_v31, %v491_v41  ;;  %v471_v32 = vld [vmem:[#allocation2 + $0x8] sm:$0xf] }
  0x98   : > { %v366_v45 = vpop.permute.xlu1 %365  ;;  %v278_v47 = vpop.permute.xlu0 %277 }
  0x99   : > { %424 = vrot.lane.b32.xlu1 %v420_v34, %s1006_s20  ;;  %510 = vrot.lane.b32.xlu0 %v506_v30, %s1004_s17  ;;  %v285_v50 = vrot.slane %v278_v47, %v1148_v22  ;;  %v373_v1 = vrot.slane %v366_v45, %v1148_v22 }
  0x9b   : > { %v287_v54 = vmul.f32 %v1175_v51, %v285_v50  ;;  %v288_v59 = vmul.f32 %v285_v50, %v1188_v58  ;;  %v375_v8 = vmul.f32 %v373_v1, %v1175_v51  ;;  %v376_v16 = vmul.f32 %v373_v1, %v360_v5 }
  0x9c   : > { %v312_v52 = vpop.permute.xlu1 %311  ;;  %v477_v63 = vpop.permute.xlu0 %476  ;;  %v1012_v50 = vmov 2  }
  0x9d   : > { %426 = vrot.lane.b32.xlu1 %v421_v40, %s1006_s20  ;;  %539 = vrot.lane.b32.xlu0 %v535_v36, %s1006_s20  ;;  %v319_v55 = vrot.slane %v312_v52, %v1148_v22  ;;  %v484_v17 = vrot.slane %v477_v63, %v1148_v22  ;;  %v1013_v52 = vmov 3  }
  0x9f   : > { %v321_v57 = vmul.f32 %v319_v55, %v1132_v12  ;;  %v322_v62 = vmul.f32 %v319_v55, %v306_v60  ;;  %v486_v29 = vmul.f32 %v484_v17, %v1175_v51  ;;  %v487_v40 = vmul.f32 %v484_v17, %v471_v32 }
  0xa0   : > { %v448_v0 = vpop.permute.xlu0 %447 }
  0xa1   : > { %512 = vrot.lane.b32.xlu1 %v507_v46, %s1004_s17  ;;  %562 = vrot.lane.b32.xlu0 %v561_v42, %s1007_s29  ;;  %v449_v13 = vrot.slane %v448_v0, 4  ;;  %s880_s29 = sshll.u32 %s1072_s25, 8  ;;  %s944_s25 = sshll.u32 %s1015_s16, 4  ;;  %s945_s25 = int_to_ptr.vmem [resolvable:$false] %s944_s25 }
  0xa2   : > { %s1245_s13 = scalar_lea.hbm %s1286_s6, %s880_s29 }
  0xa3   : > { %v450_v25 = vsel %vm299_vm0, %v449_v13, %v448_v0 }
  0xa5   : > { %541 = vrot.lane.b32.xlu1 %v536_v49, %s1006_s20  ;;  %348 = vrot.lane.b32.xlu0 %v347_v48, %s1008_s9  ;;  %v603_v48 = vld [vmem:[%s1284_s4] sm:$0xff]  ;;  %s244_s9 = scalar_lea.vmem [#allocation3], %s861_s28 }
  0xa6   : > { %s798_s10 = sshll.u32 %s244_s9, 4  ;;  %s799_s10 = int_to_ptr.vmem [resolvable:$true] %s798_s10 }
  0xa7   : > { %p947_p0 = scmp.lt.s32.totalorder %s799_s10, %s945_s25 }
  0xa9   : > { %259 = vperm.xlu1 %934, %v256_v53   ;;  %291 = vrot.lane.b32.xlu0 %v287_v54, %s1004_s17  ;;  %v755_v53 = vld [vmem:[%s1285_s5] sm:$0xff] }
  0xad   : > { %589 = vperm.xlu1 %934, %v586_v56   ;;  %325 = vrot.lane.b32.xlu0 %v321_v57, %s1006_s20 }
  0xb1   : > { %293 = vrot.lane.b32.xlu1 %v288_v59, %s1004_s17  ;;  %s946_s17 = scalar_lea.vmem %s945_s25, 512 }
  0xb2   : > { %935 = vset.pattern.permute.xlu1 %v1009_v61 }
  0xb5   : > { %327 = vrot.lane.b32.xlu1 %v322_v62, %s1006_s20  ;;  %s1014_s20 = smov 17  }
 0x107   : > { %v397_v2 = vpop.permute.xlu0 %396 }
 0x108   : > { %v398_v4 = vrot.slane %v397_v2, 4 }
 0x10a   : > { %v399_v7 = vsel %vm299_vm0, %v398_v4, %v397_v2  ;;  %v403_v20 = vadd.f32 %v398_v4, %v376_v16 }
 0x10b   : > { %v425_v11 = vpop.permute.xlu1 %424  ;;  %v511_v12 = vpop.permute.xlu0 %510  ;;  %v402_v18 = vadd.f32 %v399_v7, %v375_v8 }
 0x10c   : > { %v428_v14 = vrot.slane %v425_v11, 4  ;;  %v514_v15 = vrot.slane %v511_v12, 4 }
 0x10e   : > { %v429_v19 = vsel %vm330_vm1, %v428_v14, %v425_v11  ;;  %v515_v26 = vsel %vm299_vm0, %v514_v15, %v511_v12 }
 0x10f   : > { %v433_v21 = vadd.f32 %v429_v19, %v402_v18  ;;  %v427_v23 = vpop.permute.xlu1 %426  ;;  %v540_v24 = vpop.permute.xlu0 %539  ;;  %v519_v34 = vadd.f32 %v515_v26, %v486_v29 }
 0x110   : > { %v430_v27 = vsel %vm330_vm1, %v428_v14, %v427_v23  ;;  %v543_v28 = vrot.slane %v540_v24, 4 }
 0x111   : > { %v434_v30 = vadd.f32 %v430_v27, %v403_v20  ;;  %v453_v31 = vmul.f32 %v450_v25, %v433_v21 }
 0x112   : > { %v544_v33 = vsel %vm330_vm1, %v543_v28, %v540_v24 }
 0x113   : > { %v513_v35 = vpop.permute.xlu1 %512  ;;  %v563_v36 = vpop.permute.xlu0 %562  ;;  %457 = vrot.lane.b32.xlu1 %v453_v31, %s1010_s14  ;;  %v454_v37 = vmul.f32 %v449_v13, %v434_v30  ;;  %v548_v41 = vadd.f32 %v544_v33, %v519_v34  ;;  %v683_v34 = vsub.s32 2, %v1114_v6 }
 0x114   : > { %v516_v38 = vsel %vm299_vm0, %v514_v15, %v513_v35  ;;  %v564_v39 = vrot.slane %v563_v36, 4 }
 0x115   : > { %459 = vrot.lane.b32.xlu0 %v454_v37, %s1010_s14  ;;  %v520_v43 = vadd.f32 %v516_v38, %v487_v40  ;;  %v612_v38 = vsub.s32 4, %v1114_v6  ;;  %s784_s14 = scalar_lea.sflag [#allocation4], %s242_s26 }
 0x116   : > { %v566_v42 = vsel %vm565_vm2, %v564_v39, %v563_v36 }
 0x117   : > { %v569_v44 = vmul.f32 %v566_v42, %v548_v41  ;;  %v542_v45 = vpop.permute.xlu1 %541  ;;  %v349_v55 = vpop.permute.xlu0 %348 }
 0x118   : > { %v545_v46 = vsel %vm330_vm1, %v543_v28, %v542_v45  ;;  %v350_v13 = vrot.slane %v349_v55, 4 }
 0x119   : > { %v549_v47 = vadd.f32 %v545_v46, %v520_v43  ;;  %573 = vrot.lane.b32.xlu0 %v569_v44, %s1011_s15  ;;  %v650_v43 = vsub.s32 5, %v1114_v6  ;;  %v687_v44 = vsub.s32 6, %v1114_v6 }
 0x11a   : > { %v352_v21 = vsel %vm351_vm4, %v350_v13, %v349_v55 }
 0x11b   : > { %v570_v49 = vmul.f32 %v564_v39, %v549_v47  ;;  %v292_v57 = vpop.permute.xlu0 %291 }
 0x11c   : > { %v295_v61 = vrot.slane %v292_v57, 4 }
 0x11d   : > { %575 = vrot.lane.b32.xlu1 %v570_v49, %s1011_s15  ;;  %635 = vperm.xlu0 %933, %v603_v48   ;;  %s940_s15 = scalar_lea.vmem %s799_s10, 256 }
 0x11e   : > { %p941_p11 = scmp.ne.s32.totalorder %s799_s10, %s940_s15  ;;  %p948_p1 = scmp.lt.s32.totalorder %s946_s17, %s940_s15 }
 0x11f   : > { %v326_v62 = vpop.permute.xlu0 %325 }
 0x120   : > { %v329_v2 = vrot.slane %v326_v62, 4  ;;  %p942_p12 = pnand %p941_p11, %p1089_p5  ;;  %p949_p2 = por %p948_p1, %p947_p0 }
 0x121   : > { %672 = vperm.xlu1 %935, %v603_v48   ;;  %936 = vset.pattern.permute.xlu0 %v1012_v50 }
 0x122   : > { %709 = vperm.xlu0 %936, %v603_v48   ;;  %v331_v18 = vsel %vm330_vm1, %v329_v2, %v326_v62  ;;  %p943_p13 = pneg %p942_p12 }
 0x124   : > { %v260_v54 = vpop.permute.xlu1 %259  ;;  %p950_p3 = pnand %p949_p2, %p943_p13 }
 0x125   : > { %937 = vset.pattern.permute.xlu1 %v1013_v52  ;;  %v267_v63 = vrot.slane %v260_v54, %v1148_v22 }
 0x126   : > { %746 = vperm.xlu1 %937, %v603_v48   ;;  %939 = vset.pattern.permute.xlu0 %v1002_v3  ;;  %v724_v48 = vsub.s32 7, %v1114_v6 }
 0x127   : > { %v270_v4 = vmul.f32 %v267_v63, %v1188_v58  ;;  %v269_v7 = vmul.f32 %v1175_v51, %v267_v63 }
 0x128   : > { %v590_v56 = vpop.permute.xlu1 %589 }
 0x129   : > { %v597_v51 = vrot.slane %v590_v56, %v1148_v22  ;;  %v720_v22 = vsub.s32 3, %v1114_v6 }
 0x12a   : > { %938 = vset.pattern.permute.xlu1 %v1002_v3 }
 0x12b   : > { %758 = vperm.xlu1 %938, %v755_v53  }
 0x12c   : > { %v294_v59 = vpop.permute.xlu1 %293 }
 0x12d   : > { %v296_v60 = vrot.slane %v294_v59, 4  ;;  %v304_v8 = vadd.f32 %v294_v59, %v270_v4 }
 0x12f   : > { %v298_v0 = vsel %vm297_vm3, %v295_v61, %v296_v60 }
 0x130   : > { %v328_v1 = vpop.permute.xlu1 %327  ;;  %v300_v3 = vsel %vm299_vm0, %v292_v57, %v298_v0 }
 0x131   : > { %v332_v5 = vsel %vm330_vm1, %v329_v2, %v328_v1  ;;  %v303_v14 = vadd.f32 %v300_v3, %v269_v7 }
 0x132   : > { %v336_v15 = vadd.f32 %v332_v5, %v304_v8 }
 0x133   : > { %v335_v19 = vadd.f32 %v331_v18, %v303_v14 }
 0x134   : > { %v356_v20 = vmul.f32 %v350_v13, %v336_v15 }
 0x135   : > { %v355_v27 = vmul.f32 %v352_v21, %v335_v19 }
 0x185   : > { %v458_v11 = vpop.permute.xlu1 %457 }
 0x186   : > { %v461_v17 = vrot.slane %v458_v11, 4 }
 0x187   : > { %v460_v12 = vpop.permute.xlu0 %459 }
 0x188   : > { %v462_v16 = vrot.slane %v460_v12, 4  ;;  %v469_v24 = vadd.f32 %v460_v12, %v356_v20 }
 0x18a   : > { %v463_v58 = vsel %vm297_vm3, %v461_v17, %v462_v16 }
 0x18b   : > { %v574_v23 = vpop.permute.xlu0 %573  ;;  %v465_v25 = vsel %vm464_vm5, %v458_v11, %v463_v58 }
 0x18c   : > { %v577_v28 = vrot.slane %v574_v23, 4  ;;  %v468_v31 = vadd.f32 %v465_v25, %v355_v27 }
 0x18f   : > { %v576_v26 = vpop.permute.xlu1 %575 }
 0x190   : > { %v578_v29 = vrot.slane %v576_v26, 4  ;;  %v585_v30 = vadd.f32 %v576_v26, %v469_v24 }
 0x192   : > { %v579_v32 = vsel %vm297_vm3, %v577_v28, %v578_v29  ;;  %v600_v33 = vadd.f32 %v597_v51, %v585_v30 }
 0x193   : > { %v581_v35 = vsel %vm580_vm6, %v574_v23, %v579_v32 }
 0x194   : > { %v584_v36 = vadd.f32 %v581_v35, %v468_v31  ;;  %v602_v37 = vmax.f32 %v600_v33, 0.0 }
 0x196   : > { %v599_v39 = vadd.f32 %v597_v51, %v584_v36  ;;  %v617_v40 = vrot.slane %v602_v37, %v1124_v9  ;;  %v655_v41 = vrot.slane %v602_v37, %v1127_v10  ;;  %v692_v42 = vrot.slane %v602_v37, %v683_v34 }
 0x197   : > { %v729_v52 = vrot.slane %v602_v37, %v720_v22 }
 0x198   : > { %v601_v45 = vmax.f32 %v599_v39, 0.0  ;;  %v632_v46 = vrot.slane %v617_v40, %v1124_v9  ;;  %v636_v47 = vpop.permute.xlu0 %635  ;;  %v670_v49 = vrot.slane %v655_v41, %v1127_v10  ;;  %v707_v50 = vrot.slane %v692_v42, %v683_v34 }
 0x199   : > { %v744_v16 = vrot.slane %v729_v52, %v720_v22 }
 0x19a   : > { %v609_v53 = vrot.slane %v601_v45, %v1124_v9  ;;  %v613_v54 = vrot.slane %v601_v45, %v612_v38  ;;  %v640_v55 = vmul.f32 %v636_v47, %v632_v46  ;;  %v647_v56 = vrot.slane %v601_v45, %v1127_v10 }
 0x19b   : > { %v651_v57 = vrot.slane %v601_v45, %v650_v43  ;;  %v684_v59 = vrot.slane %v601_v45, %v683_v34  ;;  %v688_v60 = vrot.slane %v601_v45, %v687_v44  ;;  %v721_v61 = vrot.slane %v601_v45, %v720_v22 }
 0x19c   : > { %v624_v62 = vrot.slane %v609_v53, %v1124_v9  ;;  %v628_v63 = vrot.slane %v613_v54, %v1124_v9  ;;  %v673_v0 = vpop.permute.xlu1 %672  ;;  %v662_v6 = vrot.slane %v647_v56, %v1127_v10  ;;  %v725_v1 = vrot.slane %v601_v45, %v724_v48 }
 0x19d   : > { %v666_v2 = vrot.slane %v651_v57, %v1127_v10  ;;  %v677_v4 = vmul.f32 %v673_v0, %v670_v49  ;;  %v710_v3 = vpop.permute.xlu0 %709  ;;  %v699_v5 = vrot.slane %v684_v59, %v683_v34  ;;  %v703_v7 = vrot.slane %v688_v60, %v683_v34 }
 0x19e   : > { %v638_v8 = vmul.f32 %v636_v47, %v624_v62  ;;  %v639_v11 = vmul.f32 %v636_v47, %v628_v63  ;;  %v675_v12 = vmul.f32 %v673_v0, %v662_v6  ;;  %v714_v13 = vmul.f32 %v710_v3, %v707_v50 }
 0x19f   : > { %v676_v14 = vmul.f32 %v673_v0, %v666_v2  ;;  %v680_v15 = vadd.f32 %v677_v4, %v640_v55  ;;  %v712_v18 = vmul.f32 %v710_v3, %v699_v5  ;;  %v736_v9 = vrot.slane %v721_v61, %v720_v22 }
 0x1a0   : > { %v678_v17 = vadd.f32 %v675_v12, %v638_v8  ;;  %v740_v19 = vrot.slane %v725_v1, %v720_v22  ;;  %v713_v58 = vmul.f32 %v710_v3, %v703_v7 }
 0x1a1   : > { %v679_v20 = vadd.f32 %v676_v14, %v639_v11  ;;  %v717_v21 = vadd.f32 %v714_v13, %v680_v15  ;;  %v747_v23 = vpop.permute.xlu1 %746 }
 0x1a2   : > { %v715_v10 = vadd.f32 %v712_v18, %v678_v17  ;;  %v749_v24 = vmul.f32 %v747_v23, %v736_v9  ;;  %v750_v51 = vmul.f32 %v747_v23, %v740_v19  ;;  %v751_v25 = vmul.f32 %v747_v23, %v744_v16 }
 0x1a3   : > { %v716_v26 = vadd.f32 %v713_v58, %v679_v20 }
 0x1a4   : > { %v752_v27 = vadd.f32 %v749_v24, %v715_v10  ;;  %v754_v29 = vadd.f32 %v751_v25, %v717_v21 }
 0x1a5   : > { %v753_v28 = vadd.f32 %v750_v51, %v716_v26 }
 0x1a6   : > { %v759_v30 = vpop.permute.xlu1 %758 }
 0x1a7   : > { %v761_v31 = vadd.f32 %v759_v30, %v752_v27  ;;  %v762_v32 = vadd.f32 %v759_v30, %v753_v28  ;;  %v763_v33 = vadd.f32 %v759_v30, %v754_v29 }
 0x1a9   : > { %v765_v34 = vmax.f32 %v762_v32, 0.0  ;;  %v764_v35 = vmax.f32 %v761_v31, 0.0  ;;  %v766_v36 = vmax.f32 %v763_v33, 0.0 }
 0x1ab   : > { %772 = vrot.lane.b32.xlu1 %v765_v34, %s1014_s20  ;;  %770 = vrot.lane.b32.xlu0 %v764_v35, %s1014_s20 }
 0x1af   : > { %774 = vrot.lane.b32.xlu0 %v766_v36, %s1014_s20 }
 0x21d   : > { %v773_v37 = vpop.permute.xlu1 %772  ;;  %v771_v38 = vpop.permute.xlu0 %770 }
 0x21e   : > { %v777_v22 = vsel %vm776_vm7, %v771_v38, %v773_v37 }
 0x21f   : > { %781 = vst [vmem:[%s244_s9] sm:$0xff] %v777_v22 }
 0x221   : > { %v775_v39 = vpop.permute.xlu0 %774 }
 0x222   : > { %v778_v40 = vsel %vm776_vm7, %v773_v37, %v775_v39 }
 0x223   : > { %782 = vst [vmem:[%s244_s9 + $0x8] sm:$0xff] %v778_v40 }
 0x224   : > { %953 = shalt.err (!%p950_p3)
}
 0x225   : > { %s954_s18 = scalar_lea.hbm %s1245_s13, 256  ;;  %s958_s26 = scalar_lea.hbm %s1286_s6, 512 }
 0x226   : > { %p955_p4 = scmp.ne.s32.totalorder %s1245_s13, %s954_s18  ;;  %p959_p9 = scmp.lt.s32.totalorder %s1245_s13, %s1286_s6 }
 0x227   : > { %p960_p10 = scmp.lt.s32.totalorder %s958_s26, %s954_s18 }
 0x228   : > { %p956_p7 = pnand %p955_p4, %p1089_p5 }
 0x229   : > { %p961_p11 = por %p960_p10, %p959_p9 }
 0x22a   : > { %p957_p8 = pneg %p956_p7 }
 0x22c   : > { %p962_p12 = pnand %p961_p11, %p957_p8 }
 0x22e   : > { %965 = shalt.err (!%p962_p12)
}
 0x22f   : > { %881 = dma.vmem_to_hbm [thread:$0]  (%p1089_p5), %s799_s10, 256, %s1245_s13, %s784_s14  }
 0x230 PF: > { %p887_p13 = scmp.ge.s32.totalorder %s1000_s24, 2  ;;  %s810_s9 = sand.u32 1, %s988_s21  }
 0x231   : > { %s811_s11 = scalar_lea.sflag [#allocation4], %s810_s9 }
 0x232   : > { %p884_p0 = pnand %p887_p13, %p1093_p6 }
 0x234   : > { %p885_p1 = pneg %p884_p0 }
 0x236   : > { %983 = dma.done.wait (%p885_p1), %s811_s11, 256  }
 0x237   : > { %985 = vsyncadd (%p885_p1), %s811_s11, 4294967040  ;;  %p16_p2 = scmp.ge.s32.totalorder %s1076_s27, 4   ;;  %s1289_s21 = smov %s992_s22 }
 0x238   : > { %s1290_s22 = smov %s996_s23  ;;  %s1291_s23 = smov %s1087_s30 }
 0x239   : > { %s1292_s24 = smov %s1076_s27  ;;  %18 = sbr.rel (!%p16_p2) target bundleno = 3 (0x3), region = 89 }
 0x23e   :  { %816 = vsyncpa [#allocation4], 1 }
 0x23f   :  { %818 = vsyncpa [#allocation4 + $0x1], 1 }

</bundles_post_ra>
